<compile_context>
chip_gen: v7x
topology: tpu7x:2x2x1
jax: 0.10.0
libtpu: 0.0.40
codegen_flags: <defaults>
</compile_context>

<pallas_src>
import jax
import jax.numpy as jnp
from jax.experimental import pallas as pl
from jax.experimental.pallas import tpu as pltpu


def _text_projection_kernel(x_ref, w1_ref, b1_ref, w2_ref, b2_ref, o_ref):
    # linear_1: MXU matmul in the operands' native dtype, f32 accumulation.
    h = jnp.dot(x_ref[...], w1_ref[...], preferred_element_type=jnp.float32)
    h = h + b1_ref[...]  # bias kept f32 (cast once in the wrapper)

    # GELU(approximate='tanh') in f32:
    #   0.5 * h * (1 + tanh(sqrt(2/pi) * (h + 0.044715 * h^3)))
    c = 0.7978845608028654  # sqrt(2/pi)
    h = 0.5 * h * (1.0 + jnp.tanh(c * (h + 0.044715 * (h * h * h))))

    # linear_2: feed the MXU operands in the weight dtype (no-op for f32
    # weights, bf16-native path for bf16 weights), f32 accumulation.
    o = jnp.dot(h.astype(w2_ref.dtype), w2_ref[...],
                preferred_element_type=jnp.float32)
    o_ref[...] = (o + b2_ref[...]).astype(o_ref.dtype)


def _round_up(x, m):
    return ((x + m - 1) // m) * m


def _make_call(M_pad, tm, Din, H, out_dtype, buffered_weights):
    # Resident (constant index_map) operands: W1, b1, W2, b2.
    wkw = {"pipeline_mode": pl.Buffered(1)} if buffered_weights else {}
    return pl.pallas_call(
        _text_projection_kernel,
        out_shape=jax.ShapeDtypeStruct((M_pad, H), out_dtype),
        grid_spec=pltpu.PrefetchScalarGridSpec(
            num_scalar_prefetch=0,
            grid=(M_pad // tm,),
            in_specs=[
                pl.BlockSpec((tm, Din), lambda i: (i, 0)),            # x rows
                pl.BlockSpec((Din, H), lambda i: (0, 0), **wkw),      # W1
                pl.BlockSpec((1, H), lambda i: (0, 0), **wkw),        # b1
                pl.BlockSpec((H, H), lambda i: (0, 0), **wkw),        # W2
                pl.BlockSpec((1, H), lambda i: (0, 0), **wkw),        # b2
            ],
            out_specs=pl.BlockSpec((tm, H), lambda i: (i, 0)),
        ),
        compiler_params=pltpu.CompilerParams(
            dimension_semantics=("parallel",),
            vmem_limit_bytes=64 * 1024 * 1024,
        ),
    )


def text_projection(caption, w1, b1, w2, b2, *, tm=256):
    """caption: (B, S, in_features); w1: (in, hidden); b1: (hidden,);
       w2: (hidden, hidden); b2: (hidden,). Returns (B, S, hidden).

    Weights are stored (in, out), i.e. transposed vs. PyTorch nn.Linear."""
    B, S, Din = caption.shape
    H = w1.shape[1]
    M = B * S

    # Effective row tile: multiple of 8 (sublane), never larger than needed.
    tm_eff = min(tm, _round_up(M, 8))
    M_pad = _round_up(M, tm_eff)

    x2d = caption.reshape(M, Din)
    if M_pad != M:
        x2d = jnp.pad(x2d, ((0, M_pad - M), (0, 0)))

    # Biases cast/reshaped once in the wrapper (not per grid step).
    b1_2d = b1.reshape(1, H).astype(jnp.float32)
    b2_2d = b2.reshape(1, H).astype(jnp.float32)

    args = (x2d, w1, b1_2d, w2, b2_2d)
    try:
        out2d = _make_call(M_pad, tm_eff, Din, H, caption.dtype, True)(*args)
    except Exception:
        # Fallback if this JAX build rejects single-buffered pipeline_mode.
        out2d = _make_call(M_pad, tm_eff, Din, H, caption.dtype, False)(*args)

    if M_pad != M:
        out2d = out2d[:M]
    return out2d.reshape(B, S, H)


def _reference(caption, w1, b1, w2, b2):
    h = caption.astype(jnp.float32) @ w1.astype(jnp.float32) + b1
    c = 0.7978845608028654
    h = 0.5 * h * (1.0 + jnp.tanh(c * (h + 0.044715 * h ** 3)))
    o = h @ w2.astype(jnp.float32) + b2
    return o.astype(caption.dtype)


if __name__ == "__main__":
    key = jax.random.PRNGKey(0)

    # --- Test 1: small shapes consistent with the module -------------------
    B, S, Din, H = 2, 8, 32, 32
    k_x, k_w1, k_b1, k_w2, k_b2 = jax.random.split(key, 5)
    caption = jax.random.normal(k_x, (B, S, Din), dtype=jnp.float32)
    w1 = jax.random.normal(k_w1, (Din, H), dtype=jnp.float32) * 0.02
    b1 = jax.random.normal(k_b1, (H,), dtype=jnp.float32) * 0.02
    w2 = jax.random.normal(k_w2, (H, H), dtype=jnp.float32) * 0.02
    b2 = jax.random.normal(k_b2, (H,), dtype=jnp.float32) * 0.02

    out = jax.block_until_ready(text_projection(caption, w1, b1, w2, b2))
    ref = _reference(caption, w1, b1, w2, b2)
    assert out.shape == (B, S, H)
    assert jnp.allclose(out, ref, atol=1e-5, rtol=1e-5)

    # --- Test 2: lane-dense (128-aligned) features, M not divisible by tm --
    B2, S2, Din2, H2 = 2, 300, 128, 128  # M = 600 -> padded to 768, grid = 3
    k2 = jax.random.PRNGKey(1)
    k_x2, k_w12, k_b12, k_w22, k_b22 = jax.random.split(k2, 5)
    caption2 = jax.random.normal(k_x2, (B2, S2, Din2), dtype=jnp.float32)
    w1_2 = jax.random.normal(k_w12, (Din2, H2), dtype=jnp.float32) * 0.02
    b1_2 = jax.random.normal(k_b12, (H2,), dtype=jnp.float32) * 0.02
    w2_2 = jax.random.normal(k_w22, (H2, H2), dtype=jnp.float32) * 0.02
    b2_2 = jax.random.normal(k_b22, (H2,), dtype=jnp.float32) * 0.02

    out2 = jax.block_until_ready(
        text_projection(caption2, w1_2, b1_2, w2_2, b2_2))
    ref2 = _reference(caption2, w1_2, b1_2, w2_2, b2_2)
    assert out2.shape == (B2, S2, H2)
    assert jnp.allclose(out2, ref2, atol=1e-4, rtol=1e-4)

    print("KERNEL_OK")
</pallas_src>

<mosaic_0001>
module attributes {stable_mosaic.version = 11 : i64} {
  func.func @_text_projection_kernel(%arg0: i32, %arg1: memref<16x32xf32, #tpu.memory_space<vmem>>, %arg2: memref<32x32xf32, #tpu.memory_space<vmem>>, %arg3: memref<1x32xf32, #tpu.memory_space<vmem>>, %arg4: memref<32x32xf32, #tpu.memory_space<vmem>>, %arg5: memref<1x32xf32, #tpu.memory_space<vmem>>, %arg6: memref<16x32xf32, #tpu.memory_space<vmem>>) attributes {dimension_semantics = [#tpu.dimension_semantics<parallel>], iteration_bounds = array<i64: 1>, scalar_prefetch = 0 : i64, scratch_operands = 0 : i64, tpu.core_type = #tpu.core_type<tc>, window_params = [{transform_indices = @transform_0, window_bounds = array<i64: 16, 32>}, {pipeline_mode = #tpu.pipeline_mode<synchronous>, transform_indices = @transform_1, window_bounds = array<i64: 32, 32>}, {pipeline_mode = #tpu.pipeline_mode<synchronous>, transform_indices = @transform_2, window_bounds = array<i64: 1, 32>}, {pipeline_mode = #tpu.pipeline_mode<synchronous>, transform_indices = @transform_3, window_bounds = array<i64: 32, 32>}, {pipeline_mode = #tpu.pipeline_mode<synchronous>, transform_indices = @transform_4, window_bounds = array<i64: 1, 32>}, {transform_indices = @transform_5, window_bounds = array<i64: 16, 32>}]} {
    %c0 = arith.constant 0 : index
    %c0_0 = arith.constant 0 : index
    %0 = vector.load %arg1[%c0, %c0_0] : memref<16x32xf32, #tpu.memory_space<vmem>>, vector<16x32xf32>
    %c0_1 = arith.constant 0 : index
    %c0_2 = arith.constant 0 : index
    %1 = vector.load %arg2[%c0_1, %c0_2] : memref<32x32xf32, #tpu.memory_space<vmem>>, vector<32x32xf32>
    %cst = arith.constant dense<0.000000e+00> : vector<16x32xf32>
    %2 = tpu.matmul %0, %1, %cst {dimension_numbers = #tpu.dot_dimension_numbers<[1], [0], [0], [1], [0, 0, 1, 1], [], []>} : vector<16x32xf32>, vector<32x32xf32>, vector<16x32xf32> -> vector<16x32xf32>
    %c0_3 = arith.constant 0 : index
    %c0_4 = arith.constant 0 : index
    %3 = vector.load %arg3[%c0_3, %c0_4] : memref<1x32xf32, #tpu.memory_space<vmem>>, vector<1x32xf32>
    %4 = vector.broadcast %3 : vector<1x32xf32> to vector<16x32xf32>
    %5 = arith.addf %2, %4 : vector<16x32xf32>
    %cst_5 = arith.constant 5.000000e-01 : f32
    %6 = vector.broadcast %cst_5 : f32 to vector<16x32xf32>
    %7 = arith.mulf %6, %5 : vector<16x32xf32>
    %8 = arith.mulf %5, %5 : vector<16x32xf32>
    %9 = arith.mulf %8, %5 : vector<16x32xf32>
    %cst_6 = arith.constant 4.471500e-02 : f32
    %10 = vector.broadcast %cst_6 : f32 to vector<16x32xf32>
    %11 = arith.mulf %10, %9 : vector<16x32xf32>
    %12 = arith.addf %5, %11 : vector<16x32xf32>
    %cst_7 = arith.constant 0.797884583 : f32
    %13 = vector.broadcast %cst_7 : f32 to vector<16x32xf32>
    %14 = arith.mulf %13, %12 : vector<16x32xf32>
    %15 = math.tanh %14 : vector<16x32xf32>
    %cst_8 = arith.constant 1.000000e+00 : f32
    %16 = vector.broadcast %cst_8 : f32 to vector<16x32xf32>
    %17 = arith.addf %16, %15 : vector<16x32xf32>
    %18 = arith.mulf %7, %17 : vector<16x32xf32>
    %c0_9 = arith.constant 0 : index
    %c0_10 = arith.constant 0 : index
    %19 = vector.load %arg4[%c0_9, %c0_10] : memref<32x32xf32, #tpu.memory_space<vmem>>, vector<32x32xf32>
    %cst_11 = arith.constant dense<0.000000e+00> : vector<16x32xf32>
    %20 = tpu.matmul %18, %19, %cst_11 {dimension_numbers = #tpu.dot_dimension_numbers<[1], [0], [0], [1], [0, 0, 1, 1], [], []>} : vector<16x32xf32>, vector<32x32xf32>, vector<16x32xf32> -> vector<16x32xf32>
    %c0_12 = arith.constant 0 : index
    %c0_13 = arith.constant 0 : index
    %21 = vector.load %arg5[%c0_12, %c0_13] : memref<1x32xf32, #tpu.memory_space<vmem>>, vector<1x32xf32>
    %22 = vector.broadcast %21 : vector<1x32xf32> to vector<16x32xf32>
    %23 = arith.addf %20, %22 : vector<16x32xf32>
    %c0_14 = arith.constant 0 : index
    %c0_15 = arith.constant 0 : index
    %24 = vector.load %arg6[%c0_14, %c0_15] : memref<16x32xf32, #tpu.memory_space<vmem>>, vector<16x32xf32>
    tpu.vector_store %arg6[%c0_14, %c0_15], %23 {strides = array<i32>} : memref<16x32xf32, #tpu.memory_space<vmem>>, vector<16x32xf32>,
    return
  }
  func.func @transform_0(%arg0: i32) -> (i32, i32) {
    %c0_i32 = arith.constant 0 : i32
    %c0_i32_0 = arith.constant 0 : i32
    return %arg0, %c0_i32 : i32, i32
  }
  func.func @transform_1(%arg0: i32) -> (i32, i32) {
    %c0_i32 = arith.constant 0 : i32
    %c0_i32_0 = arith.constant 0 : i32
    %c0_i32_1 = arith.constant 0 : i32
    return %c0_i32, %c0_i32_0 : i32, i32
  }
  func.func @transform_2(%arg0: i32) -> (i32, i32) {
    %c0_i32 = arith.constant 0 : i32
    %c0_i32_0 = arith.constant 0 : i32
    %c0_i32_1 = arith.constant 0 : i32
    return %c0_i32, %c0_i32_0 : i32, i32
  }
  func.func @transform_3(%arg0: i32) -> (i32, i32) {
    %c0_i32 = arith.constant 0 : i32
    %c0_i32_0 = arith.constant 0 : i32
    %c0_i32_1 = arith.constant 0 : i32
    return %c0_i32, %c0_i32_0 : i32, i32
  }
  func.func @transform_4(%arg0: i32) -> (i32, i32) {
    %c0_i32 = arith.constant 0 : i32
    %c0_i32_0 = arith.constant 0 : i32
    %c0_i32_1 = arith.constant 0 : i32
    return %c0_i32, %c0_i32_0 : i32, i32
  }
  func.func @transform_5(%arg0: i32) -> (i32, i32) {
    %c0_i32 = arith.constant 0 : i32
    %c0_i32_0 = arith.constant 0 : i32
    return %arg0, %c0_i32 : i32, i32
  }
}

module attributes {stable_mosaic.version = 11 : i64} {
  func.func @_text_projection_kernel(%arg0: i32, %arg1: memref<16x32xf32, #tpu.memory_space<vmem>>, %arg2: memref<32x32xf32, #tpu.memory_space<vmem>>, %arg3: memref<1x32xf32, #tpu.memory_space<vmem>>, %arg4: memref<32x32xf32, #tpu.memory_space<vmem>>, %arg5: memref<1x32xf32, #tpu.memory_space<vmem>>, %arg6: memref<16x32xf32, #tpu.memory_space<vmem>>) attributes {dimension_semantics = [#tpu.dimension_semantics<parallel>], iteration_bounds = array<i64: 1>, scalar_prefetch = 0 : i64, scratch_operands = 0 : i64, tpu.core_type = #tpu.core_type<tc>, window_params = [{transform_indices = @transform_0, window_bounds = array<i64: 16, 32>}, {pipeline_mode = #tpu.pipeline_mode<synchronous>, transform_indices = @transform_1, window_bounds = array<i64: 32, 32>}, {pipeline_mode = #tpu.pipeline_mode<synchronous>, transform_indices = @transform_2, window_bounds = array<i64: 1, 32>}, {pipeline_mode = #tpu.pipeline_mode<synchronous>, transform_indices = @transform_3, window_bounds = array<i64: 32, 32>}, {pipeline_mode = #tpu.pipeline_mode<synchronous>, transform_indices = @transform_4, window_bounds = array<i64: 1, 32>}, {transform_indices = @transform_5, window_bounds = array<i64: 16, 32>}]} {
    %c0 = arith.constant 0 : index
    %c0_0 = arith.constant 0 : index
    %0 = vector.load %arg1[%c0, %c0_0] : memref<16x32xf32, #tpu.memory_space<vmem>>, vector<16x32xf32>
    %c0_1 = arith.constant 0 : index
    %c0_2 = arith.constant 0 : index
    %1 = vector.load %arg2[%c0_1, %c0_2] : memref<32x32xf32, #tpu.memory_space<vmem>>, vector<32x32xf32>
    %cst = arith.constant dense<0.000000e+00> : vector<16x32xf32>
    %2 = tpu.matmul %0, %1, %cst {dimension_numbers = #tpu.dot_dimension_numbers<[1], [0], [0], [1], [0, 0, 1, 1], [], []>} : vector<16x32xf32>, vector<32x32xf32>, vector<16x32xf32> -> vector<16x32xf32>
    %c0_3 = arith.constant 0 : index
    %c0_4 = arith.constant 0 : index
    %3 = vector.load %arg3[%c0_3, %c0_4] : memref<1x32xf32, #tpu.memory_space<vmem>>, vector<1x32xf32>
    %4 = vector.broadcast %3 : vector<1x32xf32> to vector<16x32xf32>
    %5 = arith.addf %2, %4 : vector<16x32xf32>
    %cst_5 = arith.constant 5.000000e-01 : f32
    %6 = vector.broadcast %cst_5 : f32 to vector<16x32xf32>
    %7 = arith.mulf %6, %5 : vector<16x32xf32>
    %8 = arith.mulf %5, %5 : vector<16x32xf32>
    %9 = arith.mulf %8, %5 : vector<16x32xf32>
    %cst_6 = arith.constant 4.471500e-02 : f32
    %10 = vector.broadcast %cst_6 : f32 to vector<16x32xf32>
    %11 = arith.mulf %10, %9 : vector<16x32xf32>
    %12 = arith.addf %5, %11 : vector<16x32xf32>
    %cst_7 = arith.constant 0.797884583 : f32
    %13 = vector.broadcast %cst_7 : f32 to vector<16x32xf32>
    %14 = arith.mulf %13, %12 : vector<16x32xf32>
    %15 = math.tanh %14 : vector<16x32xf32>
    %cst_8 = arith.constant 1.000000e+00 : f32
    %16 = vector.broadcast %cst_8 : f32 to vector<16x32xf32>
    %17 = arith.addf %16, %15 : vector<16x32xf32>
    %18 = arith.mulf %7, %17 : vector<16x32xf32>
    %c0_9 = arith.constant 0 : index
    %c0_10 = arith.constant 0 : index
    %19 = vector.load %arg4[%c0_9, %c0_10] : memref<32x32xf32, #tpu.memory_space<vmem>>, vector<32x32xf32>
    %cst_11 = arith.constant dense<0.000000e+00> : vector<16x32xf32>
    %20 = tpu.matmul %18, %19, %cst_11 {dimension_numbers = #tpu.dot_dimension_numbers<[1], [0], [0], [1], [0, 0, 1, 1], [], []>} : vector<16x32xf32>, vector<32x32xf32>, vector<16x32xf32> -> vector<16x32xf32>
    %c0_12 = arith.constant 0 : index
    %c0_13 = arith.constant 0 : index
    %21 = vector.load %arg5[%c0_12, %c0_13] : memref<1x32xf32, #tpu.memory_space<vmem>>, vector<1x32xf32>
    %22 = vector.broadcast %21 : vector<1x32xf32> to vector<16x32xf32>
    %23 = arith.addf %20, %22 : vector<16x32xf32>
    %c0_14 = arith.constant 0 : index
    %c0_15 = arith.constant 0 : index
    %24 = vector.load %arg6[%c0_14, %c0_15] : memref<16x32xf32, #tpu.memory_space<vmem>>, vector<16x32xf32>
    tpu.vector_store %arg6[%c0_14, %c0_15], %23 {strides = array<i32>} : memref<16x32xf32, #tpu.memory_space<vmem>>, vector<16x32xf32>,
    return
  }
  func.func @transform_0(%arg0: i32) -> (i32, i32) {
    %c0_i32 = arith.constant 0 : i32
    %c0_i32_0 = arith.constant 0 : i32
    return %arg0, %c0_i32 : i32, i32
  }
  func.func @transform_1(%arg0: i32) -> (i32, i32) {
    %c0_i32 = arith.constant 0 : i32
    %c0_i32_0 = arith.constant 0 : i32
    %c0_i32_1 = arith.constant 0 : i32
    return %c0_i32, %c0_i32_0 : i32, i32
  }
  func.func @transform_2(%arg0: i32) -> (i32, i32) {
    %c0_i32 = arith.constant 0 : i32
    %c0_i32_0 = arith.constant 0 : i32
    %c0_i32_1 = arith.constant 0 : i32
    return %c0_i32, %c0_i32_0 : i32, i32
  }
  func.func @transform_3(%arg0: i32) -> (i32, i32) {
    %c0_i32 = arith.constant 0 : i32
    %c0_i32_0 = arith.constant 0 : i32
    %c0_i32_1 = arith.constant 0 : i32
    return %c0_i32, %c0_i32_0 : i32, i32
  }
  func.func @transform_4(%arg0: i32) -> (i32, i32) {
    %c0_i32 = arith.constant 0 : i32
    %c0_i32_0 = arith.constant 0 : i32
    %c0_i32_1 = arith.constant 0 : i32
    return %c0_i32, %c0_i32_0 : i32, i32
  }
  func.func @transform_5(%arg0: i32) -> (i32, i32) {
    %c0_i32 = arith.constant 0 : i32
    %c0_i32_0 = arith.constant 0 : i32
    return %arg0, %c0_i32 : i32, i32
  }
}

</mosaic_0001>

<bundles_post_ra>
// kernel: tpu_custom_call.1
= control target key start
LH: loop header
LB: loop body
LE: loop exit
PB: predicated region body
PF: predicated region fallthrough
CT: control target
= control target key end

     0   :  { %10 = vsyncpa [#allocation3], 0  ;;  %s654_s0 = inlined_call_operand.hbm [shape: f32[16,32], index: 0, kind: input, shape index: {}]   ;;  %s655_s1 = inlined_call_operand.hbm [shape: f32[32,32], index: 1, kind: input, shape index: {}]   ;;  %s656_s2 = inlined_call_operand.hbm [shape: f32[1,32], index: 2, kind: input, shape index: {}]   ;;  %s657_s3 = inlined_call_operand.hbm [shape: f32[32,32], index: 3, kind: input, shape index: {}]   ;;  %s658_s4 = inlined_call_operand.hbm [shape: f32[1,32], index: 4, kind: input, shape index: {}]   ;;  %s659_s5 = inlined_call_operand.hbm [shape: f32[16,32], index: 5, kind: output, shape index: {}]  }
   0x1   :  { %11 = vsyncpa [#allocation6], 0 }
   0x2   :  { %12 = vsyncpa [#allocation9], 0 }
   0x3   :  { %13 = vsyncpa [#allocation4], 0  ;;  %s519_s18 = smov [#allocation5]   ;;  %s520_s20 = smov [#allocation8]  }
   0x4   :  { %s31_s19 = sshll.u32 %s519_s18, 4  ;;  %s53_s21 = sshll.u32 %s520_s20, 4  ;;  %s32_s19 = int_to_ptr.vmem [resolvable:$true] %s31_s19  ;;  %s557_s21 = int_to_ptr.vmem [resolvable:$true] %s53_s21 }
   0x5   :  { %s379_s24 = scalar_lea.hbm %s655_s1, 512 }
   0x6   :  { %p380_p0 = scmp.ne.s32.totalorder %s655_s1, %s379_s24  ;;  %p383_p1 = scmp.lt.u32.totalorder %s379_s24, %s655_s1 }
   0x8   :  { %p385_p2 = pnand %p383_p1, %p380_p0 }
   0xa   :  { %388 = shalt.err (!%p385_p2)
}
   0xb   :  { %s389_s29 = scalar_lea.vmem %s32_s19, 512  ;;  %p394_p4 = scmp.lt.s32.totalorder %s32_s19, %s32_s19 }
   0xc   :  { %p390_p3 = scmp.ne.s32.totalorder %s32_s19, %s389_s29  ;;  %p395_p5 = scmp.lt.s32.totalorder %s389_s29, %s389_s29 }
   0xe   :  { %p396_p6 = por %p395_p5, %p394_p4 }
  0x10   :  { %p397_p7 = pnand %p396_p6, %p390_p3 }
  0x12   :  { %400 = shalt.err (!%p397_p7)
}
  0x13   :  { %s521_s30 = smov 128   ;;  %s522_s6 = smov 8  }
  0x14   :  { %37 = dma.hbm_to_vmem [thread:$0]  %s655_s1, 512, %s32_s19, [#allocation6], %s521_s30, %s521_s30, %s522_s6  }
  0x15   :  { %s401_s11 = scalar_lea.hbm %s657_s3, 512 }
  0x16   :  { %p402_p8 = scmp.ne.s32.totalorder %s657_s3, %s401_s11  ;;  %p405_p9 = scmp.lt.u32.totalorder %s401_s11, %s657_s3 }
  0x18   :  { %p407_p10 = pnand %p405_p9, %p402_p8 }
  0x1a   :  { %410 = shalt.err (!%p407_p10)
}
  0x1b   :  { %s411_s16 = scalar_lea.vmem %s557_s21, 512  ;;  %p416_p12 = scmp.lt.s32.totalorder %s557_s21, %s557_s21 }
  0x1c   :  { %p412_p11 = scmp.ne.s32.totalorder %s557_s21, %s411_s16  ;;  %p417_p13 = scmp.lt.s32.totalorder %s411_s16, %s411_s16 }
  0x1e   :  { %p418_p0 = por %p417_p13, %p416_p12 }
  0x20   :  { %p419_p1 = pnand %p418_p0, %p412_p11 }
  0x22   :  { %422 = shalt.err (!%p419_p1)
}
  0x23   :  { %59 = dma.hbm_to_vmem [thread:$0]  %s657_s3, 512, %s557_s21, [#allocation9], %s521_s30, %s521_s30, %s522_s6  }
  0x24   :  { %s523_s18 = smov [#allocation2]   ;;  %s524_s20 = smov [#allocation7]  }
  0x25   :  { %s19_s19 = sshll.u32 %s523_s18, 4  ;;  %s44_s22 = sshll.u32 %s524_s20, 4  ;;  %s20_s19 = int_to_ptr.vmem [resolvable:$true] %s19_s19  ;;  %s45_s22 = int_to_ptr.vmem [resolvable:$true] %s44_s22 }
  0x26   :  { %s423_s25 = scalar_lea.hbm %s654_s0, 256 }
  0x27   :  { %p424_p2 = scmp.ne.s32.totalorder %s654_s0, %s423_s25  ;;  %p427_p3 = scmp.lt.u32.totalorder %s423_s25, %s654_s0 }
  0x29   :  { %p429_p4 = pnand %p427_p3, %p424_p2 }
  0x2b   :  { %432 = shalt.err (!%p429_p4)
}
  0x2c   :  { %s433_s3 = scalar_lea.vmem %s20_s19, 256  ;;  %p438_p6 = scmp.lt.s32.totalorder %s20_s19, %s20_s19 }
  0x2d   :  { %p434_p5 = scmp.ne.s32.totalorder %s20_s19, %s433_s3  ;;  %p439_p7 = scmp.lt.s32.totalorder %s433_s3, %s433_s3 }
  0x2f   :  { %p440_p8 = por %p439_p7, %p438_p6 }
  0x31   :  { %p441_p9 = pnand %p440_p8, %p434_p5 }
  0x33   :  { %444 = shalt.err (!%p441_p9)
}
  0x34   :  { %25 = dma.hbm_to_vmem [thread:$0]  %s654_s0, 256, %s20_s19, [#allocation3], %s521_s30, %s521_s30, %s522_s6  }
  0x35   :  { %s445_s10 = scalar_lea.hbm %s656_s2, 16 }
  0x36   :  { %p446_p10 = scmp.ne.s32.totalorder %s656_s2, %s445_s10  ;;  %p449_p11 = scmp.lt.u32.totalorder %s445_s10, %s656_s2 }
  0x38   :  { %p451_p12 = pnand %p449_p11, %p446_p10 }
  0x3a   :  { %454 = shalt.err (!%p451_p12)
}
  0x3b   :  { %s455_s15 = scalar_lea.vmem %s45_s22, 16  ;;  %s459_s16 = scalar_lea.vmem %s45_s22, 32 }
  0x3c   :  { %p456_p13 = scmp.ne.s32.totalorder %s45_s22, %s455_s15  ;;  %p460_p0 = scmp.lt.s32.totalorder %s45_s22, %s45_s22 }
  0x3d   :  { %p461_p1 = scmp.lt.s32.totalorder %s459_s16, %s455_s15 }
  0x3f   :  { %p462_p2 = por %p461_p1, %p460_p0 }
  0x41   :  { %p463_p3 = pnand %p462_p2, %p456_p13 }
  0x43   :  { %466 = shalt.err (!%p463_p3)
}
  0x44   :  { %47 = dma.hbm_to_vmem [thread:$0]  %s656_s2, 16, %s45_s22, [#allocation6]  }
  0x45   :  { %s525_s17 = smov [#allocation10]   ;;  %s467_s23 = scalar_lea.hbm %s658_s4, 16 }
  0x46   :  { %s66_s18 = sshll.u32 %s525_s17, 4  ;;  %p468_p4 = scmp.ne.s32.totalorder %s658_s4, %s467_s23  ;;  %s67_s18 = int_to_ptr.vmem [resolvable:$true] %s66_s18 }
  0x47   :  { %p471_p5 = scmp.lt.u32.totalorder %s467_s23, %s658_s4 }
  0x49   :  { %p473_p6 = pnand %p471_p5, %p468_p4 }
  0x4b   :  { %476 = shalt.err (!%p473_p6)
}
  0x4c   :  { %s477_s28 = scalar_lea.vmem %s67_s18, 16  ;;  %s481_s2 = scalar_lea.vmem %s67_s18, 32 }
  0x4d   :  { %p478_p7 = scmp.ne.s32.totalorder %s67_s18, %s477_s28  ;;  %p482_p8 = scmp.lt.s32.totalorder %s67_s18, %s67_s18 }
  0x4e   :  { %p483_p9 = scmp.lt.s32.totalorder %s481_s2, %s477_s28 }
  0x50   :  { %p484_p10 = por %p483_p9, %p482_p8 }
  0x52   :  { %p485_p11 = pnand %p484_p10, %p478_p7 }
  0x54   :  { %488 = shalt.err (!%p485_p11)
}
  0x55   :  { %69 = dma.hbm_to_vmem [thread:$0]  %s658_s4, 16, %s67_s18, [#allocation9]  }
  0x56   :  { %511 = dma.done.wait [#allocation3], 256  }
  0x57   :  { %512 = vsyncadd [#allocation3], 4294967040 }
  0x58   :  { %513 = dma.done.wait [#allocation6], 528  }
  0x59   :  { %514 = vsyncadd [#allocation6], 4294966768 }
  0x5a   :  { %515 = dma.done.wait [#allocation9], 528  }
  0x5b   :  { %516 = vsyncadd [#allocation9], 4294966768  ;;  %vm98_vm0 = vcmask 261120   ;;  %v87_v0 = vld [vmem:[#allocation5] sm:$0xff]  ;;  %v88_v1 = vld [vmem:[#allocation5 + $0x8] sm:$0xff]  ;;  %s526_s4 = smov [#allocation11]  }
  0x5c   :  { %v89_v2 = vld [vmem:[#allocation5 + $0x10] sm:$0xff]  ;;  %v351_v3 = vpack.c.bf16 %v88_v1, %v87_v0  ;;  %v90_v4 = vld [vmem:[#allocation5 + $0x18] sm:$0xff]  ;;  %v198_v8 = vld [vmem:[#allocation8] sm:$0xff]  ;;  %s297_s3 = sshll.u32 %s526_s4, 4  ;;  %s298_s3 = int_to_ptr.vmem [resolvable:$true] %s297_s3 }
  0x5d   :  { %v85_v5 = vld [vmem:[#allocation2] sm:$0xff]  ;;  %v355_v6 = vpack.c.bf16 %v90_v4, %v89_v2  ;;  %v86_v7 = vld [vmem:[#allocation2 + $0x8] sm:$0xff]  ;;  %v311_v14 = vld [vmem:[#allocation7] ss:$0 sm:$0xff]  ;;  %s489_s21 = scalar_lea.vmem %s298_s3, 256  ;;  %p494_p13 = scmp.lt.s32.totalorder %s298_s3, %s298_s3 }
  0x5e   :  { %337 = vmatprep.mubr.msk.f32.mxu0 %vm98_vm0, %v85_v5  ;;  %352 = vmatprep.subr.bf16.mxu0 %v351_v3  ;;  %v199_v9 = vld [vmem:[#allocation8 + $0x8] sm:$0xff]  ;;  %v200_v10 = vld [vmem:[#allocation8 + $0x10] sm:$0xff]  ;;  %v201_v12 = vld [vmem:[#allocation8 + $0x18] sm:$0xff]  ;;  %p490_p12 = scmp.ne.s32.totalorder %s298_s3, %s489_s21  ;;  %p495_p0 = scmp.lt.s32.totalorder %s489_s21, %s489_s21 }
  0x5f   :  { %354 = vmatpush3.bf16.msra.mxu0 %v351_v3  ;;  %v359_v11 = vpack.c.bf16 %v199_v9, %v198_v8  ;;  %v363_v13 = vpack.c.bf16 %v201_v12, %v200_v10  ;;  %v314_v37 = vld [vmem:[#allocation10] ss:$0 sm:$0xff] }
  0x60   :  { %356 = vmatprep.subr.bf16.mxu0 %v355_v6  ;;  %p496_p1 = por %p495_p0, %p494_p13 }
  0x61   :  { %360 = vmatprep.subr.bf16.mxu1 %v359_v11 }
  0x62   :  { %362 = vmatpush3.bf16.msra.mxu1 %v359_v11  ;;  %p497_p2 = pnand %p496_p1, %p490_p12 }
  0x63   :  { %358 = vmatpush3.bf16.msra.mxu0 %v355_v6  ;;  %364 = vmatprep.subr.bf16.mxu1 %v363_v13 }
  0x66   :  { %338 = vmatmul.mubr.msk.f32.vlgmr.msra.gmra.mrb[0].mxu0 %vm98_vm0, %v86_v7  ;;  %366 = vmatpush3.bf16.msra.mxu1 %v363_v13 }
 0x139   :  { %v339_v15 = vpop.f32.mrb[0].mxu0 }
 0x13a   :  { %v177_v16 = vadd.f32 %v339_v15, %v311_v14  ;;  %v171_v17 = vpop.f32.mrb[1].mxu0 }
 0x13b   :  { %v172_v18 = vadd.f32 %v311_v14, %v171_v17 }
 0x13c   :  { %v183_v19 = vmul.f32 %v177_v16, %v177_v16  ;;  %v181_v34 = vmul.f32 0.5, %v177_v16 }
 0x13d   :  { %v182_v20 = vmul.f32 %v172_v18, %v172_v18  ;;  %v180_v32 = vmul.f32 0.5, %v172_v18 }
 0x13e   :  { %v185_v21 = vmul.f32 %v183_v19, %v177_v16 }
 0x13f   :  { %v184_v22 = vmul.f32 %v182_v20, %v172_v18 }
 0x140   :  { %v187_v23 = vmul.f32 0.044715, %v185_v21 }
 0x141   :  { %v186_v24 = vmul.f32 0.044715, %v184_v22 }
 0x142   :  { %v189_v25 = vadd.f32 %v187_v23, %v177_v16 }
 0x143   :  { %v188_v26 = vadd.f32 %v186_v24, %v172_v18 }
 0x144   :  { %v191_v27 = vmul.f32 0.7978846, %v189_v25 }
 0x145   :  { %v190_v28 = vmul.f32 0.7978846, %v188_v26 }
 0x146   :  { %375 = vtanh.f32 %v191_v27 }
 0x147   :  { %377 = vtanh.f32 %v190_v28 }
 0x150   :  { %v376_v29 = vpop.eup %375 }
 0x151   :  { %v378_v30 = vpop.eup %377  ;;  %v195_v31 = vadd.f32 1.0, %v376_v29 }
 0x152   :  { %v194_v33 = vadd.f32 1.0, %v378_v30 }
 0x153   :  { %v197_v36 = vmul.f32 %v195_v31, %v181_v34 }
 0x154   :  { %v196_v35 = vmul.f32 %v194_v33, %v180_v32 }
 0x156   :  { %348 = vmatprep.mubr.msk.f32.mxu1 %vm98_vm0, %v196_v35 }
 0x157   :  { %349 = vmatmul.mubr.msk.f32.vlgmr.msra.gmra.mrb[0].mxu1 %vm98_vm0, %v197_v36 }
 0x22a   :  { %v350_v38 = vpop.f32.mrb[0].mxu1 }
 0x22b   :  { %v287_v39 = vadd.f32 %v350_v38, %v314_v37  ;;  %v281_v40 = vpop.f32.mrb[1].mxu1 }
 0x22c   :  { %v282_v41 = vadd.f32 %v314_v37, %v281_v40 }
 0x22d   :  { %291 = vst.msk [vmem:[#allocation11 + $0x8] sm:$0xff] %vm98_vm0, %v287_v39 }
 0x22e   :  { %290 = vst.msk [vmem:[#allocation11] sm:$0xff] %vm98_vm0, %v282_v41 }
 0x22f   :  { %500 = shalt.err (!%p497_p2)
}
 0x230   :  { %s501_s9 = scalar_lea.hbm %s659_s5, 256 }
 0x231   :  { %p502_p3 = scmp.ne.s32.totalorder %s659_s5, %s501_s9  ;;  %p505_p4 = scmp.lt.u32.totalorder %s501_s9, %s659_s5 }
 0x233   :  { %p507_p5 = pnand %p505_p4, %p502_p3 }
 0x235   :  { %510 = shalt.err (!%p507_p5)
}
 0x236   :  { %303 = dma.vmem_to_hbm [thread:$0]  %s298_s3, 256, %s659_s5, [#allocation4], %s521_s30, %s521_s30, %s522_s6  }
 0x237   :  { %517 = dma.done.wait [#allocation4], 256  }
 0x238   :  { %518 = vsyncadd [#allocation4], 4294967040 }
 0x239   :  { %307 = vsyncpa [#allocation3], 1 }
 0x23a   :  { %308 = vsyncpa [#allocation6], 1 }
 0x23b   :  { %309 = vsyncpa [#allocation9], 1 }
 0x23c   :  { %310 = vsyncpa [#allocation4], 1 }

// kernel: tpu_custom_call.1
= control target key start
LH: loop header
LB: loop body
LE: loop exit
PB: predicated region body
PF: predicated region fallthrough
CT: control target
= control target key end

     0   :  { %10 = vsyncpa [#allocation3], 0  ;;  %s654_s0 = inlined_call_operand.hbm [shape: f32[16,32], index: 0, kind: input, shape index: {}]   ;;  %s655_s1 = inlined_call_operand.hbm [shape: f32[32,32], index: 1, kind: input, shape index: {}]   ;;  %s656_s2 = inlined_call_operand.hbm [shape: f32[1,32], index: 2, kind: input, shape index: {}]   ;;  %s657_s3 = inlined_call_operand.hbm [shape: f32[32,32], index: 3, kind: input, shape index: {}]   ;;  %s658_s4 = inlined_call_operand.hbm [shape: f32[1,32], index: 4, kind: input, shape index: {}]   ;;  %s659_s5 = inlined_call_operand.hbm [shape: f32[16,32], index: 5, kind: output, shape index: {}]  }
   0x1   :  { %11 = vsyncpa [#allocation6], 0 }
   0x2   :  { %12 = vsyncpa [#allocation9], 0 }
   0x3   :  { %13 = vsyncpa [#allocation4], 0  ;;  %s519_s18 = smov [#allocation5]   ;;  %s520_s20 = smov [#allocation8]  }
   0x4   :  { %s31_s19 = sshll.u32 %s519_s18, 4  ;;  %s53_s21 = sshll.u32 %s520_s20, 4  ;;  %s32_s19 = int_to_ptr.vmem [resolvable:$true] %s31_s19  ;;  %s557_s21 = int_to_ptr.vmem [resolvable:$true] %s53_s21 }
   0x5   :  { %s379_s24 = scalar_lea.hbm %s655_s1, 512 }
   0x6   :  { %p380_p0 = scmp.ne.s32.totalorder %s655_s1, %s379_s24  ;;  %p383_p1 = scmp.lt.u32.totalorder %s379_s24, %s655_s1 }
   0x8   :  { %p385_p2 = pnand %p383_p1, %p380_p0 }
   0xa   :  { %388 = shalt.err (!%p385_p2)
}
   0xb   :  { %s389_s29 = scalar_lea.vmem %s32_s19, 512  ;;  %p394_p4 = scmp.lt.s32.totalorder %s32_s19, %s32_s19 }
   0xc   :  { %p390_p3 = scmp.ne.s32.totalorder %s32_s19, %s389_s29  ;;  %p395_p5 = scmp.lt.s32.totalorder %s389_s29, %s389_s29 }
   0xe   :  { %p396_p6 = por %p395_p5, %p394_p4 }
  0x10   :  { %p397_p7 = pnand %p396_p6, %p390_p3 }
  0x12   :  { %400 = shalt.err (!%p397_p7)
}
  0x13   :  { %s521_s30 = smov 128   ;;  %s522_s6 = smov 8  }
  0x14   :  { %37 = dma.hbm_to_vmem [thread:$0]  %s655_s1, 512, %s32_s19, [#allocation6], %s521_s30, %s521_s30, %s522_s6  }
  0x15   :  { %s401_s11 = scalar_lea.hbm %s657_s3, 512 }
  0x16   :  { %p402_p8 = scmp.ne.s32.totalorder %s657_s3, %s401_s11  ;;  %p405_p9 = scmp.lt.u32.totalorder %s401_s11, %s657_s3 }
  0x18   :  { %p407_p10 = pnand %p405_p9, %p402_p8 }
  0x1a   :  { %410 = shalt.err (!%p407_p10)
}
  0x1b   :  { %s411_s16 = scalar_lea.vmem %s557_s21, 512  ;;  %p416_p12 = scmp.lt.s32.totalorder %s557_s21, %s557_s21 }
  0x1c   :  { %p412_p11 = scmp.ne.s32.totalorder %s557_s21, %s411_s16  ;;  %p417_p13 = scmp.lt.s32.totalorder %s411_s16, %s411_s16 }
  0x1e   :  { %p418_p0 = por %p417_p13, %p416_p12 }
  0x20   :  { %p419_p1 = pnand %p418_p0, %p412_p11 }
  0x22   :  { %422 = shalt.err (!%p419_p1)
}
  0x23   :  { %59 = dma.hbm_to_vmem [thread:$0]  %s657_s3, 512, %s557_s21, [#allocation9], %s521_s30, %s521_s30, %s522_s6  }
  0x24   :  { %s523_s18 = smov [#allocation2]   ;;  %s524_s20 = smov [#allocation7]  }
  0x25   :  { %s19_s19 = sshll.u32 %s523_s18, 4  ;;  %s44_s22 = sshll.u32 %s524_s20, 4  ;;  %s20_s19 = int_to_ptr.vmem [resolvable:$true] %s19_s19  ;;  %s45_s22 = int_to_ptr.vmem [resolvable:$true] %s44_s22 }
  0x26   :  { %s423_s25 = scalar_lea.hbm %s654_s0, 256 }
  0x27   :  { %p424_p2 = scmp.ne.s32.totalorder %s654_s0, %s423_s25  ;;  %p427_p3 = scmp.lt.u32.totalorder %s423_s25, %s654_s0 }
  0x29   :  { %p429_p4 = pnand %p427_p3, %p424_p2 }
  0x2b   :  { %432 = shalt.err (!%p429_p4)
}
  0x2c   :  { %s433_s3 = scalar_lea.vmem %s20_s19, 256  ;;  %p438_p6 = scmp.lt.s32.totalorder %s20_s19, %s20_s19 }
  0x2d   :  { %p434_p5 = scmp.ne.s32.totalorder %s20_s19, %s433_s3  ;;  %p439_p7 = scmp.lt.s32.totalorder %s433_s3, %s433_s3 }
  0x2f   :  { %p440_p8 = por %p439_p7, %p438_p6 }
  0x31   :  { %p441_p9 = pnand %p440_p8, %p434_p5 }
  0x33   :  { %444 = shalt.err (!%p441_p9)
}
  0x34   :  { %25 = dma.hbm_to_vmem [thread:$0]  %s654_s0, 256, %s20_s19, [#allocation3], %s521_s30, %s521_s30, %s522_s6  }
  0x35   :  { %s445_s10 = scalar_lea.hbm %s656_s2, 16 }
  0x36   :  { %p446_p10 = scmp.ne.s32.totalorder %s656_s2, %s445_s10  ;;  %p449_p11 = scmp.lt.u32.totalorder %s445_s10, %s656_s2 }
  0x38   :  { %p451_p12 = pnand %p449_p11, %p446_p10 }
  0x3a   :  { %454 = shalt.err (!%p451_p12)
}
  0x3b   :  { %s455_s15 = scalar_lea.vmem %s45_s22, 16  ;;  %s459_s16 = scalar_lea.vmem %s45_s22, 32 }
  0x3c   :  { %p456_p13 = scmp.ne.s32.totalorder %s45_s22, %s455_s15  ;;  %p460_p0 = scmp.lt.s32.totalorder %s45_s22, %s45_s22 }
  0x3d   :  { %p461_p1 = scmp.lt.s32.totalorder %s459_s16, %s455_s15 }
  0x3f   :  { %p462_p2 = por %p461_p1, %p460_p0 }
  0x41   :  { %p463_p3 = pnand %p462_p2, %p456_p13 }
  0x43   :  { %466 = shalt.err (!%p463_p3)
}
  0x44   :  { %47 = dma.hbm_to_vmem [thread:$0]  %s656_s2, 16, %s45_s22, [#allocation6]  }
  0x45   :  { %s525_s17 = smov [#allocation10]   ;;  %s467_s23 = scalar_lea.hbm %s658_s4, 16 }
  0x46   :  { %s66_s18 = sshll.u32 %s525_s17, 4  ;;  %p468_p4 = scmp.ne.s32.totalorder %s658_s4, %s467_s23  ;;  %s67_s18 = int_to_ptr.vmem [resolvable:$true] %s66_s18 }
  0x47   :  { %p471_p5 = scmp.lt.u32.totalorder %s467_s23, %s658_s4 }
  0x49   :  { %p473_p6 = pnand %p471_p5, %p468_p4 }
  0x4b   :  { %476 = shalt.err (!%p473_p6)
}
  0x4c   :  { %s477_s28 = scalar_lea.vmem %s67_s18, 16  ;;  %s481_s2 = scalar_lea.vmem %s67_s18, 32 }
  0x4d   :  { %p478_p7 = scmp.ne.s32.totalorder %s67_s18, %s477_s28  ;;  %p482_p8 = scmp.lt.s32.totalorder %s67_s18, %s67_s18 }
  0x4e   :  { %p483_p9 = scmp.lt.s32.totalorder %s481_s2, %s477_s28 }
  0x50   :  { %p484_p10 = por %p483_p9, %p482_p8 }
  0x52   :  { %p485_p11 = pnand %p484_p10, %p478_p7 }
  0x54   :  { %488 = shalt.err (!%p485_p11)
}
  0x55   :  { %69 = dma.hbm_to_vmem [thread:$0]  %s658_s4, 16, %s67_s18, [#allocation9]  }
  0x56   :  { %511 = dma.done.wait [#allocation3], 256  }
  0x57   :  { %512 = vsyncadd [#allocation3], 4294967040 }
  0x58   :  { %513 = dma.done.wait [#allocation6], 528  }
  0x59   :  { %514 = vsyncadd [#allocation6], 4294966768 }
  0x5a   :  { %515 = dma.done.wait [#allocation9], 528  }
  0x5b   :  { %516 = vsyncadd [#allocation9], 4294966768  ;;  %vm98_vm0 = vcmask 261120   ;;  %v87_v0 = vld [vmem:[#allocation5] sm:$0xff]  ;;  %v88_v1 = vld [vmem:[#allocation5 + $0x8] sm:$0xff]  ;;  %s526_s4 = smov [#allocation11]  }
  0x5c   :  { %v89_v2 = vld [vmem:[#allocation5 + $0x10] sm:$0xff]  ;;  %v351_v3 = vpack.c.bf16 %v88_v1, %v87_v0  ;;  %v90_v4 = vld [vmem:[#allocation5 + $0x18] sm:$0xff]  ;;  %v198_v8 = vld [vmem:[#allocation8] sm:$0xff]  ;;  %s297_s3 = sshll.u32 %s526_s4, 4  ;;  %s298_s3 = int_to_ptr.vmem [resolvable:$true] %s297_s3 }
  0x5d   :  { %v85_v5 = vld [vmem:[#allocation2] sm:$0xff]  ;;  %v355_v6 = vpack.c.bf16 %v90_v4, %v89_v2  ;;  %v86_v7 = vld [vmem:[#allocation2 + $0x8] sm:$0xff]  ;;  %v311_v14 = vld [vmem:[#allocation7] ss:$0 sm:$0xff]  ;;  %s489_s21 = scalar_lea.vmem %s298_s3, 256  ;;  %p494_p13 = scmp.lt.s32.totalorder %s298_s3, %s298_s3 }
  0x5e   :  { %337 = vmatprep.mubr.msk.f32.mxu0 %vm98_vm0, %v85_v5  ;;  %352 = vmatprep.subr.bf16.mxu0 %v351_v3  ;;  %v199_v9 = vld [vmem:[#allocation8 + $0x8] sm:$0xff]  ;;  %v200_v10 = vld [vmem:[#allocation8 + $0x10] sm:$0xff]  ;;  %v201_v12 = vld [vmem:[#allocation8 + $0x18] sm:$0xff]  ;;  %p490_p12 = scmp.ne.s32.totalorder %s298_s3, %s489_s21  ;;  %p495_p0 = scmp.lt.s32.totalorder %s489_s21, %s489_s21 }
  0x5f   :  { %354 = vmatpush3.bf16.msra.mxu0 %v351_v3  ;;  %v359_v11 = vpack.c.bf16 %v199_v9, %v198_v8  ;;  %v363_v13 = vpack.c.bf16 %v201_v12, %v200_v10  ;;  %v314_v37 = vld [vmem:[#allocation10] ss:$0 sm:$0xff] }
  0x60   :  { %356 = vmatprep.subr.bf16.mxu0 %v355_v6  ;;  %p496_p1 = por %p495_p0, %p494_p13 }
  0x61   :  { %360 = vmatprep.subr.bf16.mxu1 %v359_v11 }
  0x62   :  { %362 = vmatpush3.bf16.msra.mxu1 %v359_v11  ;;  %p497_p2 = pnand %p496_p1, %p490_p12 }
  0x63   :  { %358 = vmatpush3.bf16.msra.mxu0 %v355_v6  ;;  %364 = vmatprep.subr.bf16.mxu1 %v363_v13 }
  0x66   :  { %338 = vmatmul.mubr.msk.f32.vlgmr.msra.gmra.mrb[0].mxu0 %vm98_vm0, %v86_v7  ;;  %366 = vmatpush3.bf16.msra.mxu1 %v363_v13 }
 0x139   :  { %v339_v15 = vpop.f32.mrb[0].mxu0 }
 0x13a   :  { %v177_v16 = vadd.f32 %v339_v15, %v311_v14  ;;  %v171_v17 = vpop.f32.mrb[1].mxu0 }
 0x13b   :  { %v172_v18 = vadd.f32 %v311_v14, %v171_v17 }
 0x13c   :  { %v183_v19 = vmul.f32 %v177_v16, %v177_v16  ;;  %v181_v34 = vmul.f32 0.5, %v177_v16 }
 0x13d   :  { %v182_v20 = vmul.f32 %v172_v18, %v172_v18  ;;  %v180_v32 = vmul.f32 0.5, %v172_v18 }
 0x13e   :  { %v185_v21 = vmul.f32 %v183_v19, %v177_v16 }
 0x13f   :  { %v184_v22 = vmul.f32 %v182_v20, %v172_v18 }
 0x140   :  { %v187_v23 = vmul.f32 0.044715, %v185_v21 }
 0x141   :  { %v186_v24 = vmul.f32 0.044715, %v184_v22 }
 0x142   :  { %v189_v25 = vadd.f32 %v187_v23, %v177_v16 }
 0x143   :  { %v188_v26 = vadd.f32 %v186_v24, %v172_v18 }
 0x144   :  { %v191_v27 = vmul.f32 0.7978846, %v189_v25 }
 0x145   :  { %v190_v28 = vmul.f32 0.7978846, %v188_v26 }
 0x146   :  { %375 = vtanh.f32 %v191_v27 }
 0x147   :  { %377 = vtanh.f32 %v190_v28 }
 0x150   :  { %v376_v29 = vpop.eup %375 }
 0x151   :  { %v378_v30 = vpop.eup %377  ;;  %v195_v31 = vadd.f32 1.0, %v376_v29 }
 0x152   :  { %v194_v33 = vadd.f32 1.0, %v378_v30 }
 0x153   :  { %v197_v36 = vmul.f32 %v195_v31, %v181_v34 }
 0x154   :  { %v196_v35 = vmul.f32 %v194_v33, %v180_v32 }
 0x156   :  { %348 = vmatprep.mubr.msk.f32.mxu1 %vm98_vm0, %v196_v35 }
 0x157   :  { %349 = vmatmul.mubr.msk.f32.vlgmr.msra.gmra.mrb[0].mxu1 %vm98_vm0, %v197_v36 }
 0x22a   :  { %v350_v38 = vpop.f32.mrb[0].mxu1 }
 0x22b   :  { %v287_v39 = vadd.f32 %v350_v38, %v314_v37  ;;  %v281_v40 = vpop.f32.mrb[1].mxu1 }
 0x22c   :  { %v282_v41 = vadd.f32 %v314_v37, %v281_v40 }
 0x22d   :  { %291 = vst.msk [vmem:[#allocation11 + $0x8] sm:$0xff] %vm98_vm0, %v287_v39 }
 0x22e   :  { %290 = vst.msk [vmem:[#allocation11] sm:$0xff] %vm98_vm0, %v282_v41 }
 0x22f   :  { %500 = shalt.err (!%p497_p2)
}
 0x230   :  { %s501_s9 = scalar_lea.hbm %s659_s5, 256 }
 0x231   :  { %p502_p3 = scmp.ne.s32.totalorder %s659_s5, %s501_s9  ;;  %p505_p4 = scmp.lt.u32.totalorder %s501_s9, %s659_s5 }
 0x233   :  { %p507_p5 = pnand %p505_p4, %p502_p3 }
 0x235   :  { %510 = shalt.err (!%p507_p5)
}
 0x236   :  { %303 = dma.vmem_to_hbm [thread:$0]  %s298_s3, 256, %s659_s5, [#allocation4], %s521_s30, %s521_s30, %s522_s6  }
 0x237   :  { %517 = dma.done.wait [#allocation4], 256  }
 0x238   :  { %518 = vsyncadd [#allocation4], 4294967040 }
 0x239   :  { %307 = vsyncpa [#allocation3], 1 }
 0x23a   :  { %308 = vsyncpa [#allocation6], 1 }
 0x23b   :  { %309 = vsyncpa [#allocation9], 1 }
 0x23c   :  { %310 = vsyncpa [#allocation4], 1 }

</bundles_post_ra>
